<compile_context>
chip_gen: v6e
topology: v6e:2x2x1
jax: 0.10.0
libtpu: 0.0.40
codegen_flags: <defaults>
</compile_context>

<pallas_src>
import jax
import jax.numpy as jnp
from jax import lax
from jax.experimental import pallas as pl
from jax.experimental.pallas import tpu as pltpu


def _round_up(x: int, m: int) -> int:
    return ((x + m - 1) // m) * m


def _cdiv(a: int, b: int) -> int:
    return (a + b - 1) // b


def _make_kernel(L_total: int, TL: int, num_l_steps: int, acc_dtype, init_val,
                 need_mask: bool):
    """Row-wise running max over the length axis, tiled over L."""
    n_chunks = TL // 128
    unroll = min(8, n_chunks)

    def _fold_full(x_ref, acc):
        # Fold every 128-lane chunk of the (TM, TL) tile into the register acc.
        def body(j, a):
            start = pl.multiple_of(j * 128, 128)
            return jnp.maximum(a, x_ref[:, pl.ds(start, 128)])
        return lax.fori_loop(0, n_chunks, body, acc, unroll=unroll)

    def _fold_tail(x_ref, acc):
        # Last L tile: fold only in-bounds chunks; mask the single straddling
        # chunk; skip fully out-of-bounds chunks (their VMEM is stale).
        tail_base = (num_l_steps - 1) * TL
        for j in range(n_chunks):
            lo = tail_base + j * 128
            if lo >= L_total:
                break  # fully padded chunk: never read
            chunk = x_ref[:, j * 128:(j + 1) * 128]
            if lo + 128 > L_total:
                lane = lax.broadcasted_iota(jnp.int32, (1, 128), 1)
                chunk = jnp.where(lane < (L_total - lo), chunk,
                                  jnp.asarray(init_val, dtype=acc_dtype))
            acc = jnp.maximum(acc, chunk)
        return acc

    def kernel(x_ref, o_ref, acc_ref):
        k = pl.program_id(1)
        last = pl.num_programs(1) - 1

        @pl.when(k == 0)
        def _init():
            acc_ref[...] = jnp.full(acc_ref.shape, init_val, dtype=acc_dtype)

        if need_mask:
            @pl.when(k != last)
            def _steady():
                acc_ref[...] = _fold_full(x_ref, acc_ref[...])

            @pl.when(k == last)
            def _tail_and_finalize():
                acc = _fold_tail(x_ref, acc_ref[...])
                # Last k step for this row tile: no need to write acc back.
                # Single cross-lane (XLU) reduce + single (TM, 1) store.
                o_ref[...] = jnp.max(acc, axis=-1, keepdims=True).astype(o_ref.dtype)
        else:
            acc = _fold_full(x_ref, acc_ref[...])
            acc_ref[...] = acc

            @pl.when(k == last)
            def _finalize():
                o_ref[...] = jnp.max(acc, axis=-1, keepdims=True).astype(o_ref.dtype)

    return kernel


_SMALL_BYTES = 256 * 1024  # below this, a plain XLA reduce beats any pallas_call


def global_max_pool1d(x: jax.Array, *, tm: int = 128, tl: int = 4096,
                      force_kernel: bool = False) -> jax.Array:
    """Equivalent of F.max_pool1d(x, kernel_size=x.shape[2]): (N, C, L) -> (N, C, 1)."""
    N, C, L = x.shape
    dtype = x.dtype

    # Small-input fast path: fixed pallas_call + per-grid-step overhead dominates
    # for KiB-scale inputs; a plain XLA reduction is strictly cheaper there.
    if not force_kernel and x.size * dtype.itemsize < _SMALL_BYTES:
        return jnp.max(x, axis=2, keepdims=True)

    rows = N * C
    x2 = x.reshape(rows, L)  # NCL is row-major contiguous -> free reshape

    if jnp.issubdtype(dtype, jnp.floating):
        # Accumulate in the native float dtype: max is exact in any dtype
        # (bf16 halves vregs/traffic on v6e/v7x; still correct on v5e).
        init_val = -jnp.inf
    else:
        init_val = int(jnp.iinfo(dtype).min)

    # Sublane alignment: 8 rows for 32-bit, 16 for 16-bit, 32 for 8-bit dtypes.
    row_align = max(8, 32 // dtype.itemsize)
    rows_padded = _round_up(rows, row_align)
    TM = min(tm, rows_padded)
    # Guarantee >= 2 row tiles when rows allow it so the "parallel" rows axis
    # feeds both TensorCores (v7x megacore) instead of idling one.
    if rows_padded < 2 * TM and rows_padded > row_align:
        TM = _round_up(_cdiv(rows_padded, 2), row_align)

    TL = min(tl, _round_up(L, 128))
    num_l_steps = _cdiv(L, TL)
    need_mask = (L % TL) != 0  # ragged tail of the last L tile

    grid = (_cdiv(rows, TM), num_l_steps)

    out2 = pl.pallas_call(
        _make_kernel(L, TL, num_l_steps, dtype, init_val, need_mask),
        out_shape=jax.ShapeDtypeStruct((rows, 1), dtype),
        grid_spec=pltpu.PrefetchScalarGridSpec(
            num_scalar_prefetch=0,
            grid=grid,
            in_specs=[pl.BlockSpec((TM, TL), lambda i, k: (i, k))],
            out_specs=pl.BlockSpec((TM, 1), lambda i, k: (i, 0)),
            scratch_shapes=[pltpu.VMEM((TM, 128), dtype)],
        ),
        compiler_params=pltpu.CompilerParams(
            dimension_semantics=("parallel", "arbitrary"),
        ),
    )(x2)

    return out2.reshape(N, C, 1)


if __name__ == "__main__":
    key = jax.random.PRNGKey(0)

    # Small shape consistent with the module's forward: (batch, channels, length).
    N, C, L = 2, 4, 16
    x = jax.random.normal(key, (N, C, L), dtype=jnp.float32)
    ref = jnp.max(x, axis=2, keepdims=True)

    # Fast path (plain XLA reduce) for the KiB-scale input ...
    out = global_max_pool1d(x)
    jax.block_until_ready(out)
    assert out.shape == (N, C, 1), out.shape
    assert jnp.allclose(out, ref), "mismatch vs reference (fast path)"

    # ... and the Pallas kernel on the same tiny shape (single ragged L tile).
    out_k = global_max_pool1d(x, force_kernel=True)
    jax.block_until_ready(out_k)
    assert jnp.allclose(out_k, ref), "mismatch vs reference (small, kernel)"

    # Multi-step L reduction (3 steps at TL=4096), 2 row tiles, ragged-tail
    # masking with all-negative values (any unmasked padding would win the max).
    x_big = -jnp.abs(
        jax.random.normal(jax.random.PRNGKey(1), (2, 16, 9000), dtype=jnp.float32)
    ) - 1.0
    out_big = global_max_pool1d(x_big)
    jax.block_until_ready(out_big)
    assert jnp.allclose(
        out_big, jnp.max(x_big, axis=2, keepdims=True)
    ), "mismatch vs reference (tiled f32)"

    # bf16-native accumulation path (max is exact in any dtype).
    x_bf16 = x_big.astype(jnp.bfloat16)
    out_bf16 = global_max_pool1d(x_bf16)
    jax.block_until_ready(out_bf16)
    assert jnp.allclose(
        out_bf16, jnp.max(x_bf16, axis=2, keepdims=True)
    ), "mismatch vs reference (tiled bf16)"

    print("KERNEL_OK")
</pallas_src>

<mosaic_0001>
module attributes {stable_mosaic.version = 11 : i64} {
  func.func @kernel(%arg0: i32, %arg1: i32, %arg2: memref<8x128xf32, #tpu.memory_space<vmem>>, %arg3: memref<8x1xf32, #tpu.memory_space<vmem>>, %arg4: memref<8x128xf32, #tpu.memory_space<vmem>>) attributes {dimension_semantics = [#tpu.dimension_semantics<parallel>, #tpu.dimension_semantics<arbitrary>], iteration_bounds = array<i64: 1, 1>, scalar_prefetch = 0 : i64, scratch_operands = 1 : i64, tpu.core_type = #tpu.core_type<tc>, window_params = [{transform_indices = @transform_0, window_bounds = array<i64: 8, 128>}, {transform_indices = @transform_1, window_bounds = array<i64: 8, 1>}]} {
    %c0_i32 = arith.constant 0 : i32
    %0 = arith.cmpi eq, %arg1, %c0_i32 : i32
    %1 = arith.extui %0 : i1 to i32
    %c0_i32_0 = arith.constant 0 : i32
    %2 = arith.cmpi ne, %1, %c0_i32_0 : i32
    scf.if %2 {
      %cst = arith.constant 0xFF800000 : f32
      %9 = vector.broadcast %cst : f32 to vector<8x128xf32>
      %c0 = arith.constant 0 : index
      %c0_5 = arith.constant 0 : index
      %10 = vector.load %arg4[%c0, %c0_5] : memref<8x128xf32, #tpu.memory_space<vmem>>, vector<8x128xf32>
      tpu.vector_store %arg4[%c0, %c0_5], %9 {strides = array<i32>} : memref<8x128xf32, #tpu.memory_space<vmem>>, vector<8x128xf32>,
    } else {
    }
    %c0_i32_1 = arith.constant 0 : i32
    %3 = arith.cmpi ne, %arg1, %c0_i32_1 : i32
    %4 = arith.extui %3 : i1 to i32
    %c0_i32_2 = arith.constant 0 : i32
    %5 = arith.cmpi ne, %4, %c0_i32_2 : i32
    scf.if %5 {
      %c0 = arith.constant 0 : index
      %c0_5 = arith.constant 0 : index
      %9 = vector.load %arg4[%c0, %c0_5] : memref<8x128xf32, #tpu.memory_space<vmem>>, vector<8x128xf32>
      %c0_i32_6 = arith.constant 0 : i32
      %c128_i32 = arith.constant 128 : i32
      %10 = arith.muli %c0_i32_6, %c128_i32 : i32
      %11 = tpu.assume_multiple %10, 128 : i32
      %c0_7 = arith.constant 0 : index
      %12 = arith.index_cast %11 : i32 to index
      %13 = vector.load %arg2[%c0_7, %12] : memref<8x128xf32, #tpu.memory_space<vmem>>, vector<8x128xf32>
      %14 = arith.maximumf %9, %13 : vector<8x128xf32>
      %c1_i32 = arith.constant 1 : i32
      %c0_8 = arith.constant 0 : index
      %c0_9 = arith.constant 0 : index
      %15 = vector.load %arg4[%c0_8, %c0_9] : memref<8x128xf32, #tpu.memory_space<vmem>>, vector<8x128xf32>
      tpu.vector_store %arg4[%c0_8, %c0_9], %14 {strides = array<i32>} : memref<8x128xf32, #tpu.memory_space<vmem>>, vector<8x128xf32>,
    } else {
    }
    %c0_i32_3 = arith.constant 0 : i32
    %6 = arith.cmpi eq, %arg1, %c0_i32_3 : i32
    %7 = arith.extui %6 : i1 to i32
    %c0_i32_4 = arith.constant 0 : i32
    %8 = arith.cmpi ne, %7, %c0_i32_4 : i32
    scf.if %8 {
      %c0 = arith.constant 0 : index
      %c0_5 = arith.constant 0 : index
      %9 = vector.load %arg4[%c0, %c0_5] : memref<8x128xf32, #tpu.memory_space<vmem>>, vector<8x128xf32>
      %c0_6 = arith.constant 0 : index
      %c0_7 = arith.constant 0 : index
      %10 = vector.load %arg2[%c0_6, %c0_7] : memref<8x128xf32, #tpu.memory_space<vmem>>, vector<8x128xf32>
      %11 = tpu.iota {dimensions = array<i32: 1>} : vector<1x128xi32>
      %c16_i32 = arith.constant 16 : i32
      %12 = vector.broadcast %c16_i32 : i32 to vector<1x128xi32>
      %13 = arith.cmpi slt, %11, %12 : vector<1x128xi32>
      %cst = arith.constant 0xFF800000 : f32
      %14 = vector.shape_cast %13 : vector<1x128xi1> to vector<1x128xi1>
      %15 = vector.broadcast %14 : vector<1x128xi1> to vector<8x128xi1>
      %16 = vector.broadcast %cst : f32 to vector<8x128xf32>
      %17 = arith.select %15, %10, %16 : vector<8x128xi1>, vector<8x128xf32>
      %18 = arith.maximumf %9, %17 : vector<8x128xf32>
      %cst_8 = arith.constant dense<0xFF800000> : vector<8xf32>
      %19 = vector.multi_reduction <maximumf>, %18, %cst_8 [1] : vector<8x128xf32> to vector<8xf32>
      %20 = vector.shape_cast %19 : vector<8xf32> to vector<8x1xf32>
      %c0_9 = arith.constant 0 : index
      %c0_10 = arith.constant 0 : index
      %21 = vector.load %arg3[%c0_9, %c0_10] : memref<8x1xf32, #tpu.memory_space<vmem>>, vector<8x1xf32>
      tpu.vector_store %arg3[%c0_9, %c0_10], %20 {strides = array<i32>} : memref<8x1xf32, #tpu.memory_space<vmem>>, vector<8x1xf32>,
    } else {
    }
    return
  }
  func.func @transform_0(%arg0: i32, %arg1: i32) -> (i32, i32) {
    %c0_i32 = arith.constant 0 : i32
    return %arg0, %arg1 : i32, i32
  }
  func.func @transform_1(%arg0: i32, %arg1: i32) -> (i32, i32) {
    %c0_i32 = arith.constant 0 : i32
    %c0_i32_0 = arith.constant 0 : i32
    return %arg0, %c0_i32 : i32, i32
  }
}

</mosaic_0001>

<bundles_post_ra>
// kernel: tpu_custom_call.1
= control target key start
LH: loop header
LB: loop body
LE: loop exit
PB: predicated region body
PF: predicated region fallthrough
CT: control target
= control target key end

     0   :  { %6 = vsyncpa [#allocation4], 0  ;;  %s77_s6 = smov [#allocation3]   ;;  %s94_s0 = inlined_call_operand.hbm [shape: f32[8,16], index: 0, kind: input, shape index: {}]   ;;  %s95_s1 = inlined_call_operand.vmem [shape: f32[8,1], index: 1, kind: output, shape index: {}]  }
   0x1   :  { %s13_s7 = sshll.u32 %s77_s6, 4  ;;  %s14_s7 = int_to_ptr.vmem [resolvable:$true] %s13_s7 }
   0x2   :  { %s63_s8 = scalar_lea.vmem %s14_s7, 128  ;;  %p68_p1 = scmp.lt.s32.totalorder %s14_s7, %s14_s7 }
   0x3   :  { %p64_p0 = scmp.ne.s32.totalorder %s14_s7, %s63_s8  ;;  %p69_p2 = scmp.lt.s32.totalorder %s63_s8, %s63_s8 }
   0x5   :  { %p70_p3 = por %p69_p2, %p68_p1 }
   0x7   :  { %p71_p4 = pnand %p70_p3, %p64_p0 }
   0x9   :  { %74 = shalt.err (!%p71_p4)
}
   0xa   :  { %16 = dma.hbm_to_vmem [thread:$0]  %s94_s0, 128, %s14_s7, [#allocation4]  }
   0xb   :  { %75 = dma.done.wait [#allocation4], 128  }
   0xc   :  { %76 = vsyncadd [#allocation4], 4294967168  ;;  %v38_v0 = vlaneseq  ;;  %v37_v2 = vld [vmem:[#allocation3] sm:$0xff]  ;;  %vm47_vm1 = vcmask 7168  }
   0xe   :  { %v39_v1 = vand.u32 127, %v38_v0 }
  0x10   :  { %vm40_vm0 = vcmp.lt.s32.totalorder %v39_v1, 16 }
  0x11   :  { %v43_v3 = vsel %vm40_vm0, %v37_v2, -inf }
  0x12   :  { %45 = vmax.xlane.f32.xlu0 %v43_v3 }
  0x9b   :  { %v46_v4 = vpop.xlane.xlu0 %45 }
  0x9c   :  { %48 = vst.msk [vmem:[%s95_s1] sm:$0xff] %vm47_vm1, %v46_v4 }
  0x9d   :  { %53 = vsyncpa [#allocation4], 1 }

</bundles_post_ra>
